<compile_context>
chip_gen: v7x
topology: tpu7x:2x2x1
jax: 0.10.0
libtpu: 0.0.40
codegen_flags: <defaults>
</compile_context>

<pallas_src>
import functools

import jax
import jax.numpy as jnp
from jax.experimental import pallas as pl
from jax.experimental.pallas import tpu as pltpu


def attn_head_kernel(xj_ref, f1_ref, f2_ref, wsf_t_ref, scal_ref, o_ref,
                     acc_ref, *, slab_dtype):
    # xj_ref   : (B, TJ, H)  bf16 VMEM   x rows for the j-tile
    # f1_ref   : (B, TI, 1)  f32  VMEM   precomputed f1 for the i-tile rows
    # f2_ref   : (B, 1, TJ)  f32  VMEM   precomputed f2 for the j-tile rows
    # wsf_t_ref: (H, Fp)     bf16 VMEM   projection weight, transposed/padded
    # scal_ref : (1,)        f32  SMEM   [attn_bias]
    # o_ref    : (B, TI, Fp) bf16 VMEM   output tile
    # acc_ref  : (B, TI, Fp) f32  VMEM   scratch accumulator (persists over j)
    j_step = pl.program_id(1)

    @pl.when(j_step == 0)
    def _init():
        acc_ref[...] = jnp.zeros_like(acc_ref)

    x_j = xj_ref[...]                                    # (B, TJ, H) bf16
    B, TJ, H = x_j.shape
    Fp = wsf_t_ref.shape[1]

    # H->F projection of the j-tile: one flattened 2-D bf16 MXU matmul with
    # f32 accumulation; a single cast to bf16 right out of the matmul (the
    # only seq_fts copy kept live is the bf16 one fed to the 2nd matmul).
    seq_fts_j = jnp.dot(x_j.reshape(B * TJ, H), wsf_t_ref[...],
                        preferred_element_type=jnp.float32)
    seq_fts_j = seq_fts_j.astype(jnp.bfloat16).reshape(B, TJ, Fp)

    # Pre-transposed attention matrix: logits_t[b,i,j] = f1[b,i] + f2[b,j]
    # (== logits[b,j,i]).  The softmax below is over b, i.e. elementwise in
    # (i,j), so the transposed form is exactly equivalent and the second
    # contraction needs no XLU transpose.
    f1 = f1_ref[...].astype(slab_dtype)                  # (B, TI, 1)
    f2 = f2_ref[...].astype(slab_dtype)                  # (B, 1, TJ)
    logits_t = f1 + f2                                   # (B, TI, TJ)
    lrelu = jnp.maximum(logits_t, 0.01 * logits_t)       # leaky-relu, 2 VPU ops

    # Softmax over the batch axis (PyTorch legacy F.softmax(dim=None) -> dim=0).
    # Reductions over b are cheap vreg-wise maxima/sums, not cross-lane work.
    m = jnp.max(lrelu, axis=0, keepdims=True)
    e = jnp.exp(lrelu - m)
    denom = jnp.sum(e, axis=0, keepdims=True)
    inv = pl.reciprocal(denom.astype(jnp.float32), approx=True)   # EUP slot
    coefs_t = (e * inv.astype(slab_dtype)).astype(jnp.bfloat16)   # (B, TI, TJ)

    # vals[b, i, :] += coefs_t[b, i, :] @ seq_fts_j[b, :, :]  (bf16 MXU, f32 acc)
    acc_ref[...] += jnp.einsum('bij,bjf->bif', coefs_t, seq_fts_j,
                               preferred_element_type=jnp.float32)

    @pl.when(j_step == pl.num_programs(1) - 1)
    def _finalize():
        ret = acc_ref[...] + scal_ref[0]
        # ELU (alpha = 1); bf16 store keeps lane-dense 128-wide unmasked
        # stores and halves the padded-output writeback.
        o_ref[...] = jnp.where(ret > 0, ret, jnp.exp(ret) - 1.0).astype(o_ref.dtype)


def _round_up(x, m):
    return ((x + m - 1) // m) * m


def _choose_tile(n, tile_n):
    """Pick (tile, n_pad).  tile is either the full (8-aligned) extent or a
    multiple of 128 (so the lane-major f2 block satisfies the (8,128) rule);
    when the problem is large enough we force >= 2 i-tiles so both v7x
    TensorCores get work on the 'parallel' i axis."""
    n8 = _round_up(n, 8)
    if n8 <= 128:
        return n8, n8                              # single full-extent tile
    n_units = _round_up(n8, 128) // 128            # extent in 128-row units
    max_units = max(1, _round_up(max(tile_n, 128), 128) // 128)
    n_tiles = max(2, -(-n_units // max_units))     # >= 2 tiles (2 TCs on v7x)
    tile_units = -(-n_units // n_tiles)
    tile = tile_units * 128
    return tile, tile * n_tiles


def _default_slab_dtype():
    """bf16 softmax slab where the VPU/EUP handle it natively (v6e / v7x);
    f32 on older generations (v5e has no bf16 VPU/EUP)."""
    try:
        kind = jax.devices()[0].device_kind.lower()
    except Exception:
        return jnp.float32
    return jnp.bfloat16 if ("v6" in kind or "v7" in kind) else jnp.float32


def attn_head(seq, w_seq_fts, w_f1, b_f1, w_f2, b_f2, attn_bias, *,
              tile_n=512, slab_dtype=None):
    """AttnHead forward.  seq: (B, N, H) float32.  Returns (B, N, F) float32.

    `slab_dtype` controls the dtype of the (B, TI, TJ) leaky-relu/softmax slab
    (None = auto: bf16 on v6e/v7x, f32 on older chips)."""
    if slab_dtype is None:
        slab_dtype = _default_slab_dtype()

    seq = seq.astype(jnp.float32)
    w_seq_fts = w_seq_fts.astype(jnp.float32)
    w_f1 = w_f1.astype(jnp.float32)
    w_f2 = w_f2.astype(jnp.float32)

    B, N, H = seq.shape
    F = w_seq_fts.shape[0]

    tile, n_pad = _choose_tile(N, tile_n)
    f_pad = _round_up(F, 128)          # lane-dense output / full MXU columns

    # f1/f2 fused through the projection and precomputed ONCE (pure JAX, f32):
    #   f1[b,n] = seq[b,n,:] @ (w_f1 @ W_seq_fts)^T + b_f1   (likewise f2)
    # so the kernel never reads x for them (removes the xi stream and two
    # lane-sparse (B,T,H) reductions per grid step).
    w1e = (w_f1 @ w_seq_fts)[0]        # (H,)
    w2e = (w_f2 @ w_seq_fts)[0]        # (H,)
    f1_all = jnp.einsum('bnh,h->bn', seq, w1e) + jnp.asarray(b_f1, jnp.float32)
    f2_all = jnp.einsum('bnh,h->bn', seq, w2e) + jnp.asarray(b_f2, jnp.float32)

    # Zero-padded inputs.  Padded j rows project to exactly-zero seq_fts so
    # they contribute nothing to the j accumulation; padded i rows / padded F
    # channels are sliced off below.  x is streamed in bf16.
    x = jnp.zeros((B, n_pad, H), jnp.bfloat16).at[:, :N, :].set(
        seq.astype(jnp.bfloat16))
    f1p = jnp.zeros((B, n_pad, 1), jnp.float32).at[:, :N, 0].set(f1_all)
    f2p = jnp.zeros((B, 1, n_pad), jnp.float32).at[:, 0, :N].set(f2_all)

    # Projection weight pre-transposed/padded to (H, Fp), bf16, VMEM-resident.
    wsf_t = jnp.zeros((H, f_pad), jnp.float32).at[:, :F].set(w_seq_fts.T)
    wsf_t = wsf_t.astype(jnp.bfloat16)

    scalars = jnp.asarray(attn_bias, jnp.float32).reshape((1,))   # -> SMEM

    grid = (n_pad // tile, n_pad // tile)
    kernel = functools.partial(attn_head_kernel, slab_dtype=slab_dtype)

    out = pl.pallas_call(
        kernel,
        out_shape=jax.ShapeDtypeStruct((B, n_pad, f_pad), jnp.bfloat16),
        grid=grid,
        in_specs=[
            pl.BlockSpec((B, tile, H), lambda i, j: (0, j, 0)),   # x, j-tile
            pl.BlockSpec((B, tile, 1), lambda i, j: (0, i, 0)),   # f1, i-tile
            pl.BlockSpec((B, 1, tile), lambda i, j: (0, 0, j)),   # f2, j-tile
            pl.BlockSpec((H, f_pad), lambda i, j: (0, 0)),        # resident W
            pl.BlockSpec(memory_space=pltpu.MemorySpace.SMEM),    # attn bias
        ],
        out_specs=pl.BlockSpec((B, tile, f_pad), lambda i, j: (0, i, 0)),
        scratch_shapes=[pltpu.VMEM((B, tile, f_pad), jnp.float32)],
        compiler_params=pltpu.CompilerParams(
            dimension_semantics=("parallel", "arbitrary"),
            vmem_limit_bytes=64 * 1024 * 1024),
    )(x, f1p, f2p, wsf_t, scalars)

    return out[:, :N, :F].astype(jnp.float32)


def attn_head_reference(seq, w_seq_fts, w_f1, b_f1, w_f2, b_f2, attn_bias):
    """Pure-JAX f32 reference mirroring the PyTorch forward (default args)."""
    seq_fts = jnp.einsum('bnh,fh->bnf', seq, w_seq_fts)
    f1 = jnp.einsum('bnf,f->bn', seq_fts, w_f1[0]) + b_f1
    f2 = jnp.einsum('bnf,f->bn', seq_fts, w_f2[0]) + b_f2
    logits = f2[:, :, None] + f1[:, None, :]        # logits[b,i,j]=f1[b,j]+f2[b,i]
    lrelu = jnp.where(logits >= 0, logits, 0.01 * logits)
    coefs = jax.nn.softmax(lrelu, axis=0)           # legacy dim=0 softmax
    vals = jnp.einsum('bji,bjf->bif', coefs, seq_fts)
    ret = vals + attn_bias
    return jnp.where(ret > 0, ret, jnp.exp(ret) - 1.0)


def _run_case(key, B, N, H, OUT, tile_n, slab_dtype, tol):
    k_x, k_wsf, k_w1, k_b1, k_w2, k_b2 = jax.random.split(key, 6)
    seq = jax.random.normal(k_x, (B, N, H), dtype=jnp.float32)
    w_seq_fts = 0.1 * jax.random.normal(k_wsf, (OUT, H), dtype=jnp.float32)
    w_f1 = 0.1 * jax.random.normal(k_w1, (1, OUT), dtype=jnp.float32)
    b_f1 = 0.1 * jax.random.normal(k_b1, (), dtype=jnp.float32)
    w_f2 = 0.1 * jax.random.normal(k_w2, (1, OUT), dtype=jnp.float32)
    b_f2 = 0.1 * jax.random.normal(k_b2, (), dtype=jnp.float32)
    attn_bias = jnp.zeros((), dtype=jnp.float32)    # reset_parameters -> 0

    out = attn_head(seq, w_seq_fts, w_f1, b_f1, w_f2, b_f2, attn_bias,
                    tile_n=tile_n, slab_dtype=slab_dtype)
    out = jax.block_until_ready(out)
    ref = attn_head_reference(seq, w_seq_fts, w_f1, b_f1, w_f2, b_f2, attn_bias)

    assert out.shape == (B, N, OUT)
    # bf16 MXU operands (+ optional bf16 softmax slab) over an N-length
    # contraction: compare max abs error against the output scale.
    err = float(jnp.max(jnp.abs(out - ref)))
    scale = float(jnp.maximum(jnp.max(jnp.abs(ref)), 1.0))
    assert err <= tol * scale, (
        f"shape {(B, N, H, OUT)}: max abs err {err} > {tol * scale}")


if __name__ == "__main__":
    key = jax.random.PRNGKey(0)
    k1, k2 = jax.random.split(key)

    # Small module-consistent shape: single-tile grid, f32 softmax slab
    # (the v5e code path).
    _run_case(k1, B=2, N=8, H=32, OUT=16, tile_n=512,
              slab_dtype=jnp.float32, tol=2e-2)

    # Larger shape exercising the (2,2) grid, j-accumulation, N/F padding and
    # the auto (generation-dependent) softmax-slab dtype.
    _run_case(k2, B=2, N=200, H=32, OUT=16, tile_n=512,
              slab_dtype=None, tol=2e-2)

    print("KERNEL_OK")
</pallas_src>

<mosaic_0001>
module attributes {stable_mosaic.version = 11 : i64} {
  func.func @attn_head_kernel(%arg0: i32, %arg1: i32, %arg2: memref<2x8x32xbf16, #tpu.memory_space<vmem>>, %arg3: memref<2x8x1xf32, #tpu.memory_space<vmem>>, %arg4: memref<2x1x8xf32, #tpu.memory_space<vmem>>, %arg5: memref<32x128xbf16, #tpu.memory_space<vmem>>, %arg6: memref<1xf32, #tpu.memory_space<smem>>, %arg7: memref<2x8x128xbf16, #tpu.memory_space<vmem>>, %arg8: memref<2x8x128xf32, #tpu.memory_space<vmem>>) attributes {dimension_semantics = [#tpu.dimension_semantics<parallel>, #tpu.dimension_semantics<arbitrary>], iteration_bounds = array<i64: 1, 1>, scalar_prefetch = 0 : i64, scratch_operands = 1 : i64, tpu.core_type = #tpu.core_type<tc>, window_params = [{transform_indices = @transform_0, window_bounds = array<i64: 2, 8, 32>}, {transform_indices = @transform_1, window_bounds = array<i64: 2, 8, 1>}, {transform_indices = @transform_2, window_bounds = array<i64: 2, 1, 8>}, {pipeline_mode = #tpu.pipeline_mode<synchronous>, transform_indices = @transform_3, window_bounds = array<i64: 32, 128>}, {transform_indices = @transform_4, window_bounds = array<i64: 1>}, {transform_indices = @transform_5, window_bounds = array<i64: 2, 8, 128>}]} {
    %c0_i32 = arith.constant 0 : i32
    %0 = arith.cmpi eq, %arg1, %c0_i32 : i32
    %1 = arith.extui %0 : i1 to i32
    %c0_i32_0 = arith.constant 0 : i32
    %2 = arith.cmpi ne, %1, %c0_i32_0 : i32
    scf.if %2 {
      %cst_23 = arith.constant 0.000000e+00 : f32
      %35 = vector.broadcast %cst_23 : f32 to vector<2x8x128xf32>
      %c0_24 = arith.constant 0 : index
      %c0_25 = arith.constant 0 : index
      %c0_26 = arith.constant 0 : index
      %36 = vector.load %arg8[%c0_24, %c0_25, %c0_26] : memref<2x8x128xf32, #tpu.memory_space<vmem>>, vector<2x8x128xf32>
      tpu.vector_store %arg8[%c0_24, %c0_25, %c0_26], %35 {strides = array<i32>} : memref<2x8x128xf32, #tpu.memory_space<vmem>>, vector<2x8x128xf32>,
    } else {
    }
    %c0 = arith.constant 0 : index
    %c0_1 = arith.constant 0 : index
    %c0_2 = arith.constant 0 : index
    %3 = vector.load %arg2[%c0, %c0_1, %c0_2] : memref<2x8x32xbf16, #tpu.memory_space<vmem>>, vector<2x8x32xbf16>
    %4 = vector.shape_cast %3 : vector<2x8x32xbf16> to vector<16x32xbf16>
    %c0_3 = arith.constant 0 : index
    %c0_4 = arith.constant 0 : index
    %5 = vector.load %arg5[%c0_3, %c0_4] : memref<32x128xbf16, #tpu.memory_space<vmem>>, vector<32x128xbf16>
    %cst = arith.constant dense<0.000000e+00> : vector<16x128xf32>
    %6 = tpu.matmul %4, %5, %cst {dimension_numbers = #tpu.dot_dimension_numbers<[1], [0], [0], [1], [0, 0, 1, 1], [], []>} : vector<16x32xbf16>, vector<32x128xbf16>, vector<16x128xf32> -> vector<16x128xf32>
    %7 = arith.truncf %6 : vector<16x128xf32> to vector<16x128xbf16>
    %8 = vector.shape_cast %7 : vector<16x128xbf16> to vector<2x8x128xbf16>
    %c0_5 = arith.constant 0 : index
    %c0_6 = arith.constant 0 : index
    %c0_7 = arith.constant 0 : index
    %9 = vector.load %arg3[%c0_5, %c0_6, %c0_7] : memref<2x8x1xf32, #tpu.memory_space<vmem>>, vector<2x8x1xf32>
    %c0_8 = arith.constant 0 : index
    %c0_9 = arith.constant 0 : index
    %c0_10 = arith.constant 0 : index
    %10 = vector.load %arg4[%c0_8, %c0_9, %c0_10] : memref<2x1x8xf32, #tpu.memory_space<vmem>>, vector<2x1x8xf32>
    %11 = vector.broadcast %9 : vector<2x8x1xf32> to vector<2x8x8xf32>
    %12 = vector.broadcast %10 : vector<2x1x8xf32> to vector<2x8x8xf32>
    %13 = arith.addf %11, %12 : vector<2x8x8xf32>
    %cst_11 = arith.constant 0.00999999977 : f32
    %14 = vector.broadcast %cst_11 : f32 to vector<2x8x8xf32>
    %15 = arith.mulf %14, %13 : vector<2x8x8xf32>
    %16 = arith.maximumf %13, %15 : vector<2x8x8xf32>
    %cst_12 = arith.constant dense<0xFF800000> : vector<8x8xf32>
    %17 = vector.multi_reduction <maximumf>, %16, %cst_12 [0] : vector<2x8x8xf32> to vector<8x8xf32>
    %18 = vector.shape_cast %17 : vector<8x8xf32> to vector<1x8x8xf32>
    %19 = vector.broadcast %18 : vector<1x8x8xf32> to vector<2x8x8xf32>
    %20 = arith.subf %16, %19 : vector<2x8x8xf32>
    %21 = math.exp %20 : vector<2x8x8xf32>
    %cst_13 = arith.constant dense<0.000000e+00> : vector<8x8xf32>
    %22 = vector.multi_reduction <add>, %21, %cst_13 [0] : vector<2x8x8xf32> to vector<8x8xf32>
    %23 = vector.shape_cast %22 : vector<8x8xf32> to vector<1x8x8xf32>
    %24 = tpu.reciprocal %23 {approx = true} : vector<1x8x8xf32> -> vector<1x8x8xf32>
    %25 = vector.broadcast %24 : vector<1x8x8xf32> to vector<2x8x8xf32>
    %26 = arith.mulf %21, %25 : vector<2x8x8xf32>
    %27 = arith.truncf %26 : vector<2x8x8xf32> to vector<2x8x8xbf16>
    %c0_14 = arith.constant 0 : index
    %c0_15 = arith.constant 0 : index
    %c0_16 = arith.constant 0 : index
    %28 = vector.load %arg8[%c0_14, %c0_15, %c0_16] : memref<2x8x128xf32, #tpu.memory_space<vmem>>, vector<2x8x128xf32>
    "tpu.trace_start"() <{level = 10 : i32, message = "bij,bjf->bif"}> : () -> ()
    %cst_17 = arith.constant dense<0.000000e+00> : vector<2x8x128xf32>
    %29 = tpu.matmul %27, %8, %cst_17 {dimension_numbers = #tpu.dot_dimension_numbers<[2], [1], [1], [2], [0, 0, 0, 1, 1, 2], [0], [0]>} : vector<2x8x8xbf16>, vector<2x8x128xbf16>, vector<2x8x128xf32> -> vector<2x8x128xf32>
    "tpu.trace_stop"() : () -> ()
    %30 = arith.addf %28, %29 : vector<2x8x128xf32>
    %c0_18 = arith.constant 0 : index
    %c0_19 = arith.constant 0 : index
    %c0_20 = arith.constant 0 : index
    %31 = vector.load %arg8[%c0_18, %c0_19, %c0_20] : memref<2x8x128xf32, #tpu.memory_space<vmem>>, vector<2x8x128xf32>
    tpu.vector_store %arg8[%c0_18, %c0_19, %c0_20], %30 {strides = array<i32>} : memref<2x8x128xf32, #tpu.memory_space<vmem>>, vector<2x8x128xf32>,
    %c0_i32_21 = arith.constant 0 : i32
    %32 = arith.cmpi eq, %arg1, %c0_i32_21 : i32
    %33 = arith.extui %32 : i1 to i32
    %c0_i32_22 = arith.constant 0 : i32
    %34 = arith.cmpi ne, %33, %c0_i32_22 : i32
    scf.if %34 {
      %c0_23 = arith.constant 0 : index
      %c0_24 = arith.constant 0 : index
      %c0_25 = arith.constant 0 : index
      %35 = vector.load %arg8[%c0_23, %c0_24, %c0_25] : memref<2x8x128xf32, #tpu.memory_space<vmem>>, vector<2x8x128xf32>
      %c0_26 = arith.constant 0 : index
      %36 = memref.load %arg6[%c0_26] : memref<1xf32, #tpu.memory_space<smem>>
      %37 = vector.broadcast %36 : f32 to vector<2x8x128xf32>
      %38 = arith.addf %35, %37 : vector<2x8x128xf32>
      %cst_27 = arith.constant 0.000000e+00 : f32
      %39 = vector.broadcast %cst_27 : f32 to vector<2x8x128xf32>
      %40 = arith.cmpf ogt, %38, %39 : vector<2x8x128xf32>
      %41 = math.exp %38 : vector<2x8x128xf32>
      %cst_28 = arith.constant 1.000000e+00 : f32
      %42 = vector.broadcast %cst_28 : f32 to vector<2x8x128xf32>
      %43 = arith.subf %41, %42 : vector<2x8x128xf32>
      %44 = arith.select %40, %38, %43 : vector<2x8x128xi1>, vector<2x8x128xf32>
      %45 = arith.truncf %44 : vector<2x8x128xf32> to vector<2x8x128xbf16>
      %c0_29 = arith.constant 0 : index
      %c0_30 = arith.constant 0 : index
      %c0_31 = arith.constant 0 : index
      %46 = vector.load %arg7[%c0_29, %c0_30, %c0_31] : memref<2x8x128xbf16, #tpu.memory_space<vmem>>, vector<2x8x128xbf16>
      tpu.vector_store %arg7[%c0_29, %c0_30, %c0_31], %45 {strides = array<i32>} : memref<2x8x128xbf16, #tpu.memory_space<vmem>>, vector<2x8x128xbf16>,
    } else {
    }
    return
  }
  func.func @transform_0(%arg0: i32, %arg1: i32) -> (i32, i32, i32) {
    %c0_i32 = arith.constant 0 : i32
    %c0_i32_0 = arith.constant 0 : i32
    %c0_i32_1 = arith.constant 0 : i32
    return %c0_i32, %arg1, %c0_i32_0 : i32, i32, i32
  }
  func.func @transform_1(%arg0: i32, %arg1: i32) -> (i32, i32, i32) {
    %c0_i32 = arith.constant 0 : i32
    %c0_i32_0 = arith.constant 0 : i32
    %c0_i32_1 = arith.constant 0 : i32
    return %c0_i32, %arg0, %c0_i32_0 : i32, i32, i32
  }
  func.func @transform_2(%arg0: i32, %arg1: i32) -> (i32, i32, i32) {
    %c0_i32 = arith.constant 0 : i32
    %c0_i32_0 = arith.constant 0 : i32
    %c0_i32_1 = arith.constant 0 : i32
    return %c0_i32, %c0_i32_0, %arg1 : i32, i32, i32
  }
  func.func @transform_3(%arg0: i32, %arg1: i32) -> (i32, i32) {
    %c0_i32 = arith.constant 0 : i32
    %c0_i32_0 = arith.constant 0 : i32
    %c0_i32_1 = arith.constant 0 : i32
    return %c0_i32, %c0_i32_0 : i32, i32
  }
  func.func @transform_4(%arg0: i32, %arg1: i32) -> i32 {
    %c0_i32 = arith.constant 0 : i32
    %c0_i32_0 = arith.constant 0 : i32
    return %c0_i32 : i32
  }
  func.func @transform_5(%arg0: i32, %arg1: i32) -> (i32, i32, i32) {
    %c0_i32 = arith.constant 0 : i32
    %c0_i32_0 = arith.constant 0 : i32
    %c0_i32_1 = arith.constant 0 : i32
    return %c0_i32, %arg0, %c0_i32_0 : i32, i32, i32
  }
}

</mosaic_0001>

<bundles_post_ra>
// kernel: tpu_custom_call.1
= control target key start
LH: loop header
LB: loop body
LE: loop exit
PB: predicated region body
PF: predicated region fallthrough
CT: control target
= control target key end

     0   :  { %11 = vsyncpa [#allocation5], 0  ;;  %s666_s0 = inlined_call_operand.hbm [shape: bf16[2,8,32], index: 0, kind: input, shape index: {}]   ;;  %s667_s1 = inlined_call_operand.hbm [shape: f32[2,8,1], index: 1, kind: input, shape index: {}]   ;;  %s668_s2 = inlined_call_operand.hbm [shape: f32[2,1,8], index: 2, kind: input, shape index: {}]   ;;  %s669_s3 = inlined_call_operand.hbm [shape: bf16[32,128], index: 3, kind: input, shape index: {}]   ;;  %s670_s4 = inlined_call_operand.<no memory space> [shape: f32[1], index: 4, kind: input, shape index: {}]   ;;  %s671_s5 = inlined_call_operand.hbm [shape: bf16[2,8,128], index: 5, kind: output, shape index: {}]  }
   0x1   :  { %12 = vsyncpa [#allocation8], 0 }
   0x2   :  { %13 = vsyncpa [#allocation11], 0 }
   0x3   :  { %14 = vsyncpa [#allocation6], 0  ;;  %s541_s18 = smov [#allocation7]   ;;  %s423_s22 = scalar_lea.hbm %s667_s1, 256 }
   0x4   :  { %s32_s19 = sshll.u32 %s541_s18, 4  ;;  %p424_p0 = scmp.ne.s32.totalorder %s667_s1, %s423_s22  ;;  %s33_s19 = int_to_ptr.vmem [resolvable:$true] %s32_s19 }
   0x5   :  { %p427_p1 = scmp.lt.u32.totalorder %s423_s22, %s667_s1 }
   0x7   :  { %p429_p2 = pnand %p427_p1, %p424_p0 }
   0x9   :  { %432 = shalt.err (!%p429_p2)
}
   0xa   :  { %s433_s27 = scalar_lea.vmem %s33_s19, 256  ;;  %p438_p4 = scmp.lt.s32.totalorder %s33_s19, %s33_s19 }
   0xb   :  { %p434_p3 = scmp.ne.s32.totalorder %s33_s19, %s433_s27  ;;  %p439_p5 = scmp.lt.s32.totalorder %s433_s27, %s433_s27 }
   0xd   :  { %p440_p6 = por %p439_p5, %p438_p4 }
   0xf   :  { %p441_p7 = pnand %p440_p6, %p434_p3 }
  0x11   :  { %444 = shalt.err (!%p441_p7)
}
  0x12   :  { %s542_s28 = smov 128   ;;  %s543_s29 = smov 8  }
  0x13   :  { %38 = dma.hbm_to_vmem [thread:$0]  %s667_s1, 256, %s33_s19, [#allocation8], %s542_s28, %s542_s28, %s543_s29  }
  0x14   :  { %s544_s7 = smov [#allocation4]   ;;  %s445_s11 = scalar_lea.hbm %s666_s0, 128 }
  0x15   :  { %s20_s8 = sshll.u32 %s544_s7, 4  ;;  %p446_p8 = scmp.ne.s32.totalorder %s666_s0, %s445_s11  ;;  %s21_s8 = int_to_ptr.vmem [resolvable:$true] %s20_s8 }
  0x16   :  { %p449_p9 = scmp.lt.u32.totalorder %s445_s11, %s666_s0 }
  0x18   :  { %p451_p10 = pnand %p449_p9, %p446_p8 }
  0x1a   :  { %454 = shalt.err (!%p451_p10)
}
  0x1b   :  { %s455_s16 = scalar_lea.vmem %s21_s8, 128  ;;  %p460_p12 = scmp.lt.s32.totalorder %s21_s8, %s21_s8 }
  0x1c   :  { %p456_p11 = scmp.ne.s32.totalorder %s21_s8, %s455_s16  ;;  %p461_p13 = scmp.lt.s32.totalorder %s455_s16, %s455_s16 }
  0x1e   :  { %p462_p0 = por %p461_p13, %p460_p12 }
  0x20   :  { %p463_p1 = pnand %p462_p0, %p456_p11 }
  0x22   :  { %466 = shalt.err (!%p463_p1)
}
  0x23   :  { %s545_s1 = smov 64   ;;  %s546_s17 = smov 4  }
  0x24   :  { %26 = dma.hbm_to_vmem [thread:$0]  %s666_s0, 128, %s21_s8, [#allocation5], %s545_s1, %s545_s1, %s546_s17  }
  0x25   :  { %s547_s20 = smov [#allocation9]   ;;  %s467_s24 = scalar_lea.hbm %s668_s2, 32 }
  0x26   :  { %s44_s21 = sshll.u32 %s547_s20, 4  ;;  %p468_p2 = scmp.ne.s32.totalorder %s668_s2, %s467_s24  ;;  %s45_s21 = int_to_ptr.vmem [resolvable:$true] %s44_s21 }
  0x27   :  { %p471_p3 = scmp.lt.u32.totalorder %s467_s24, %s668_s2 }
  0x29   :  { %p473_p4 = pnand %p471_p3, %p468_p2 }
  0x2b   :  { %476 = shalt.err (!%p473_p4)
}
  0x2c   :  { %s477_s29 = scalar_lea.vmem %s45_s21, 32  ;;  %p482_p6 = scmp.lt.s32.totalorder %s45_s21, %s45_s21 }
  0x2d   :  { %p478_p5 = scmp.ne.s32.totalorder %s45_s21, %s477_s29  ;;  %p483_p7 = scmp.lt.s32.totalorder %s477_s29, %s477_s29 }
  0x2f   :  { %p484_p8 = por %p483_p7, %p482_p6 }
  0x31   :  { %p485_p9 = pnand %p484_p8, %p478_p5 }
  0x33   :  { %488 = shalt.err (!%p485_p9)
}
  0x34   :  { %s548_s0 = smov 16   ;;  %s549_s30 = smov 1  }
  0x35   :  { %50 = dma.hbm_to_vmem [thread:$0]  %s668_s2, 32, %s45_s21, [#allocation8], %s548_s0, %s548_s0, %s549_s30  }
  0x36   :  { %s550_s8 = smov [#allocation10]   ;;  %s489_s12 = scalar_lea.hbm %s669_s3, 256 }
  0x37   :  { %s56_s9 = sshll.u32 %s550_s8, 4  ;;  %p490_p10 = scmp.ne.s32.totalorder %s669_s3, %s489_s12  ;;  %s57_s9 = int_to_ptr.vmem [resolvable:$true] %s56_s9 }
  0x38   :  { %p493_p11 = scmp.lt.u32.totalorder %s489_s12, %s669_s3 }
  0x3a   :  { %p495_p12 = pnand %p493_p11, %p490_p10 }
  0x3c   :  { %498 = shalt.err (!%p495_p12)
}
  0x3d   :  { %s499_s18 = scalar_lea.vmem %s57_s9, 256  ;;  %p504_p0 = scmp.lt.s32.totalorder %s57_s9, %s57_s9 }
  0x3e   :  { %p500_p13 = scmp.ne.s32.totalorder %s57_s9, %s499_s18  ;;  %p505_p1 = scmp.lt.s32.totalorder %s499_s18, %s499_s18 }
  0x40   :  { %p506_p2 = por %p505_p1, %p504_p0 }
  0x42   :  { %p507_p3 = pnand %p506_p2, %p500_p13 }
  0x44   :  { %510 = shalt.err (!%p507_p3)
}
  0x45   :  { %62 = dma.hbm_to_vmem [thread:$0]  %s669_s3, 256, %s57_s9, [#allocation11], %s545_s1, %s545_s1, %s546_s17  }
  0x46   :  { %533 = dma.done.wait [#allocation5], 128  }
  0x47   :  { %534 = vsyncadd [#allocation5], 4294967168 }
  0x48   :  { %535 = dma.done.wait [#allocation8], 288  }
  0x49   :  { %536 = vsyncadd [#allocation8], 4294967008 }
  0x4a   :  { %537 = dma.done.wait [#allocation11], 256  }
  0x4b   :  { %538 = vsyncadd [#allocation11], 4294967040  ;;  %v551_v0 = vmov 0.0   ;;  %vm552_vm0 = vmmov 0   ;;  %v553_v1 = vmov 0   ;;  %v410_v2 = vld [vmem:[#allocation10] sm:$0xff]   ;;  %v313_v42 = vstv %s670_s4 }
  0x4c   :  { %375 = vmatprep.subr.bf16.mxu0 %v551_v0  ;;  %379 = vmatprep.mubr.msk.bf16.mxu0 %vm552_vm0, %v551_v0  ;;  %v411_v3 = vld [vmem:[#allocation10 + $0x8] sm:$0xff]   ;;  %v159_v6 = vld [vmem:[#allocation7 + $0x8] sm:$0xff]  ;;  %vm107_vm1 = vcmask 261120   ;;  %v355_v8 = vld [vmem:[#allocation9] ss:$0 sm:$0xff]  ;;  %vm190_vm2 = vcmask 64512  }
  0x4d   :  { %409 = vset.pattern.permute.xlu0 %v553_v1  ;;  %383 = vmatprep.subr.bf16.mxu1 %v551_v0  ;;  %v158_v4 = vld [vmem:[#allocation7] sm:$0xff]  ;;  %v412_v5 = vld [vmem:[#allocation4] sm:$0xff]   ;;  %v356_v9 = vld [vmem:[#allocation9 + $0x1] ss:$0 sm:$0xff]  ;;  %vm213_vm3 = vcmask 1043456   ;;  %s554_s21 = smov [#allocation12]  }
  0x4e   :  { %385 = vmatprep.mubr.msk.bf16.mxu1 %vm552_vm0, %v551_v0  ;;  %376 = vmatpush3.bf16.msra.mxu0 %v410_v2  ;;  %s335_s4 = sshll.u32 %s554_s21, 4  ;;  %s336_s4 = int_to_ptr.vmem [resolvable:$true] %s335_s4 }
  0x4f   :  { %377 = vmatprep.subr.bf16.mxu0 %v551_v0  ;;  %164 = vperm.xlu0 %409, %v158_v4   ;;  %s511_s22 = scalar_lea.vmem %s336_s4, 128  ;;  %p516_p5 = scmp.lt.s32.totalorder %s336_s4, %s336_s4 }
  0x50   :  { %p512_p4 = scmp.ne.s32.totalorder %s336_s4, %s511_s22  ;;  %p517_p6 = scmp.lt.s32.totalorder %s511_s22, %s511_s22 }
  0x52   :  { %378 = vmatpush3.bf16.msra.mxu0 %v411_v3  ;;  %p518_p7 = por %p517_p6, %p516_p5 }
  0x53   :  { %169 = vperm.xlu0 %409, %v159_v6  }
  0x54   :  { %p519_p8 = pnand %p518_p7, %p512_p4 }
  0x55   :  { %380 = vmatmul.mubr.msk.bf16.vlgmr.msra.gmra.mrb[0].mxu0 %vm107_vm1, %v412_v5 }
  0xce   :  { %v165_v7 = vpop.permute.xlu0 %164 }
  0xcf   :  { %v184_v11 = vadd.f32 %v355_v8, %v165_v7 }
  0xd1   :  { %v186_v13 = vmul.f32 0.01, %v184_v11 }
  0xd2   :  { %v170_v10 = vpop.permute.xlu0 %169 }
  0xd3   :  { %v185_v12 = vadd.f32 %v356_v9, %v170_v10  ;;  %v188_v15 = vmax.f32 %v184_v11, %v186_v13 }
  0xd5   :  { %v187_v14 = vmul.f32 0.01, %v185_v12  ;;  %v191_v17 = vsel %vm190_vm2, %v188_v15, -inf }
  0xd7   :  { %v189_v16 = vmax.f32 %v185_v12, %v187_v14 }
  0xd9   :  { %v192_v18 = vsel %vm190_vm2, %v189_v16, -inf }
  0xda   :  { %v193_v19 = vmax.f32 %v191_v17, %v192_v18 }
  0xdc   :  { %v194_v20 = vsub.f32 %v188_v15, %v193_v19  ;;  %v195_v21 = vsub.f32 %v189_v16, %v193_v19 }
  0xde   :  { %v196_v22 = vmul.f32 1.442695, %v194_v20  ;;  %v198_v23 = vmul.f32 1.442695, %v195_v21 }
  0xe0   :  { %413 = vpow2.f32 %v196_v22 }
  0xe1   :  { %415 = vpow2.f32 %v198_v23 }
  0xea   :  { %v414_v24 = vpop.eup %413 }
  0xeb   :  { %v416_v25 = vpop.eup %415  ;;  %v200_v26 = vsel %vm190_vm2, %v414_v24, 0.0 }
  0xec   :  { %v201_v27 = vsel %vm190_vm2, %v416_v25, 0.0 }
  0xed   :  { %v202_v28 = vadd.f32 %v201_v27, %v200_v26 }
  0xef   :  { %417 = vrcp.f32 %v202_v28 }
  0xf9   :  { %v418_v29 = vpop.eup %417 }
  0xfa   :  { %v204_v33 = vmul.f32 %v418_v29, %v414_v24  ;;  %v205_v40 = vmul.f32 %v418_v29, %v416_v25 }
  0xfc   :  { %v206_v38 = vpack.c.bf16 %v204_v33, %v204_v33  ;;  %v207_v41 = vpack.c.bf16 %v205_v40, %v205_v40 }
 0x128   :  { %v145_v30 = vpop.f32.mrb[0].mxu0 }
 0x129   :  { %v361_v31 = vpack.c.bf16 %v145_v30, %v145_v30  ;;  %v381_v32 = vpop.f32.mrb[1].mxu0 }
 0x12a   :  { %v148_v34 = vpop.f32.mrb[2].mxu0 }
 0x12b   :  { %v362_v35 = vpack.c.bf16 %v148_v34, %v148_v34  ;;  %v382_v36 = vpop.f32.mrb[3].mxu0  ;;  %v215_v37 = vsel %vm213_vm3, %v361_v31, 0 }
 0x12c   :  { %384 = vmatpush3.bf16.msra.mxu1 %v215_v37 }
 0x12d   :  { %389 = vmatprep.subr.bf16.mxu1 %v551_v0  ;;  %v261_v39 = vsel %vm213_vm3, %v362_v35, 0 }
 0x12f   :  { %386 = vmatmul.mubr.msk.bf16.vlgmr.msra.gmra.mrb[0].mxu1 %vm190_vm2, %v206_v38 }
 0x130   :  { %390 = vmatpush3.bf16.msra.mxu1 %v261_v39  ;;  %391 = vmatprep.mubr.msk.bf16.mxu1 %vm552_vm0, %v551_v0 }
 0x137   :  { %392 = vmatmul.mubr.msk.bf16.vlgmr.msra.gmra.mrb[4].mxu1 %vm190_vm2, %v207_v41 }
 0x202   :  { %v251_v43 = vpop.f32.mrb[0].mxu1 }
 0x203   :  { %v314_v44 = vadd.f32 %v313_v42, %v251_v43  ;;  %v387_v45 = vpop.f32.mrb[1].mxu1 }
 0x204   :  { %v254_v46 = vpop.f32.mrb[2].mxu1 }
 0x205   :  { %v388_v47 = vpop.f32.mrb[3].mxu1  ;;  %v318_v48 = vmul.f32 1.442695, %v314_v44  ;;  %vm316_vm4 = vcmp.gt.f32.partialorder %v314_v44, 0.0 }
 0x207   :  { %419 = vpow2.f32 %v318_v48 }
 0x20a   :  { %v297_v49 = vpop.f32.mrb[4].mxu1 }
 0x20b   :  { %v315_v50 = vadd.f32 %v313_v42, %v297_v49  ;;  %v393_v51 = vpop.f32.mrb[5].mxu1 }
 0x20c   :  { %v300_v52 = vpop.f32.mrb[6].mxu1 }
 0x20d   :  { %v320_v53 = vmul.f32 1.442695, %v315_v50  ;;  %v394_v54 = vpop.f32.mrb[7].mxu1  ;;  %vm317_vm5 = vcmp.gt.f32.partialorder %v315_v50, 0.0 }
 0x20f   :  { %421 = vpow2.f32 %v320_v53 }
 0x211   :  { %v420_v55 = vpop.eup %419 }
 0x212   :  { %v359_v56 = vadd.f32 -1.0, %v420_v55 }
 0x214   :  { %v324_v59 = vsel %vm316_vm4, %v314_v44, %v359_v56 }
 0x219   :  { %v422_v57 = vpop.eup %421 }
 0x21a   :  { %v360_v58 = vadd.f32 -1.0, %v422_v57 }
 0x21c   :  { %v325_v60 = vsel %vm317_vm5, %v315_v50, %v360_v58 }
 0x21d   :  { %v366_v61 = vpack.c.bf16 %v325_v60, %v324_v59 }
 0x21f   :  { %367 = vst [vmem:[#allocation12] sm:$0xff] %v366_v61  }
 0x220   :  { %522 = shalt.err (!%p519_p8)
}
 0x221   :  { %s523_s25 = scalar_lea.hbm %s671_s5, 128 }
 0x222   :  { %p524_p9 = scmp.ne.s32.totalorder %s671_s5, %s523_s25  ;;  %p527_p10 = scmp.lt.u32.totalorder %s523_s25, %s671_s5 }
 0x224   :  { %p529_p11 = pnand %p527_p10, %p524_p9 }
 0x226   :  { %532 = shalt.err (!%p529_p11)
}
 0x227   :  { %341 = dma.vmem_to_hbm [thread:$0]  %s336_s4, 128, %s671_s5, [#allocation6], %s545_s1, %s545_s1, %s546_s17  }
 0x228   :  { %539 = dma.done.wait [#allocation6], 128  }
 0x229   :  { %540 = vsyncadd [#allocation6], 4294967168 }
 0x22a   :  { %345 = vsyncpa [#allocation5], 1 }
 0x22b   :  { %346 = vsyncpa [#allocation8], 1 }
 0x22c   :  { %347 = vsyncpa [#allocation11], 1 }
 0x22d   :  { %348 = vsyncpa [#allocation6], 1 }

</bundles_post_ra>
